<compile_context>
chip_gen: v7x
topology: tpu7x:2x2x1
jax: 0.10.0
libtpu: 0.0.40
codegen_flags: <defaults>
</compile_context>

<pallas_src>
import functools

import jax
import jax.numpy as jnp
from jax import lax
from jax.experimental import pallas as pl
from jax.experimental.pallas import tpu as pltpu

# Module hyper-parameters (defaults from SGPL.__init__)
ALPHA_NEG = -2.0
BETA_NEG = 6.0
CLIP = 0.05
LS = 0.1


def _sgpl_kernel(x_ref, tgt_ref, k_ref, out_ref, *,
                 b_true, block_b, num_classes, mask_tail):
    i = pl.program_id(0)

    x = x_ref[...].astype(jnp.float32)          # (TB, C) logits (bf16 cast in-kernel)
    tgt = tgt_ref[...]                          # (TB, 1) int32 class indices
    k = k_ref[...]                              # (TB, 1) f32 K_ci gathered in wrapper

    tb, c = x.shape

    # Stable log-sum-exp pieces (no log_preds tile is ever materialized).
    m = jnp.max(x, axis=-1, keepdims=True)                          # (TB, 1)
    z = x - m                                                       # (TB, C)
    lse = jnp.log(jnp.sum(jnp.exp(z), axis=-1, keepdims=True))      # (TB, 1)

    # Target-column gather via a one-hot select (used once).
    col = lax.broadcasted_iota(jnp.int32, (tb, c), 1)
    one_hot = col == tgt                                            # (TB, C) bool
    x_t = jnp.sum(jnp.where(one_hot, x, 0.0), axis=-1, keepdims=True)   # (TB, 1)

    lp_t = x_t - m - lse                                            # log p_t
    sum_lp = jnp.sum(z, axis=-1, keepdims=True) - num_classes * lse # sum_c log p_c
    pt = jnp.exp(lp_t)                                              # (TB, 1)

    # phi_pt = clamp(pt + K_ci * clip, max=1); log(phi_pt)
    phi_pt = jnp.minimum(pt + k * CLIP, 1.0)
    log_phi = jnp.log(phi_pt)

    # pusai = (alpha_neg * (1 - pt) + beta_neg) * K_ci
    pusai = (ALPHA_NEG * (1.0 - pt) + BETA_NEG) * k

    # one_sided_w = (1 - pt) ** pusai   (pusai == 0 -> 1, torch.pow semantics; K_ci>=0)
    base = jnp.maximum(1.0 - pt, jnp.float32(1e-38))
    one_sided_w = jnp.where(pusai == 0.0, jnp.float32(1.0),
                            jnp.exp(pusai * jnp.log(base)))

    loss_at_target = log_phi * one_sided_w                          # (TB, 1)

    # Folded scatter + label smoothing:
    #   sum_c[(one_hot*loss_t + log_preds*(1-one_hot)) * (one_hot*(1-ls) + ls/C)]
    # = loss_t*(1 - ls + ls/C) + (ls/C)*(sum(log_preds) - lp_t)
    ls_c = LS / num_classes
    row = loss_at_target * (1.0 - LS + ls_c) + ls_c * (sum_lp - lp_t)   # (TB, 1)

    if mask_tail:
        # Only emitted when B is not a multiple of the tile; select discards the
        # (possibly garbage) values computed on padded rows.
        row_idx = i * block_b + lax.broadcasted_iota(jnp.int32, (tb, 1), 0)
        row = jnp.where(row_idx < b_true, row, 0.0)

    partial = jnp.sum(row)                                          # scalar

    # Lane-dense per-tile partial: broadcast-fill; wrapper reads element [i, 0, 0].
    out_ref[...] = jnp.full(out_ref.shape, partial, dtype=jnp.float32)


def sgpl_loss(logits, target, k_ci, *, block_b=None):
    """logits: (B, C) float (f32 or bf16), target: (B,) int, k_ci: (C,) -> scalar loss."""
    B, C = logits.shape
    itemsize = jnp.dtype(logits.dtype).itemsize

    if block_b is None:
        # Estimate per-row VMEM: double-buffered input tile + ~3 live f32 (TB,C)
        # temporaries (x cast, z, exp(z)); budget ~24 MiB total so the kernel stays
        # inside the 48 MiB scoped limit on every TPU generation (v7x: 64 MiB/TC).
        per_row = 2 * C * itemsize + 3 * C * 4
        budget = 24 * 1024 * 1024
        rows = max(1, budget // per_row)
        align = 16 if itemsize < 4 else 8          # bf16 sublane packing
        rows = max(align, (rows // align) * align)
        if B <= rows:
            block_b = B
            if B >= 1024:
                # Keep >=2 grid steps so both v7x TensorCores are used.
                half = -(-B // 2)
                block_b = -(-half // align) * align
        else:
            block_b = rows

    nt = pl.cdiv(B, block_b)
    tgt = target.reshape(B, 1).astype(jnp.int32)
    # Per-row K_ci gather done once in XLA (cheap) instead of per-tile in the kernel.
    k_row = k_ci[target].astype(jnp.float32).reshape(B, 1)

    kernel = functools.partial(
        _sgpl_kernel, b_true=B, block_b=block_b, num_classes=C,
        mask_tail=(B % block_b) != 0)

    partials = pl.pallas_call(
        kernel,
        out_shape=jax.ShapeDtypeStruct((nt, 8, 128), jnp.float32),
        grid=(nt,),
        in_specs=[
            pl.BlockSpec((block_b, C), lambda i: (i, 0)),   # logits: streamed per tile
            pl.BlockSpec((block_b, 1), lambda i: (i, 0)),   # targets
            pl.BlockSpec((block_b, 1), lambda i: (i, 0)),   # gathered K_ci per row
        ],
        out_specs=pl.BlockSpec((1, 8, 128), lambda i: (i, 0, 0)),
        compiler_params=pltpu.CompilerParams(
            dimension_semantics=("parallel",),
            vmem_limit_bytes=48 * 1024 * 1024,
        ),
    )(logits, tgt, k_row)

    return -jnp.sum(partials[:, 0, 0]) / B


def sgpl_ref(logits, target, k_ci):
    """Pure-JAX reference mirroring the PyTorch forward."""
    B, C = logits.shape
    log_preds = jax.nn.log_softmax(logits.astype(jnp.float32), axis=-1)
    prob = jnp.exp(log_preds)
    one_hot = jax.nn.one_hot(target, C, dtype=jnp.float32)
    pt = jnp.take_along_axis(prob, target[:, None], axis=1)
    k = k_ci[target][:, None].astype(jnp.float32)
    phi_pt = jnp.minimum(pt + k * CLIP, 1.0)
    log_phi = jnp.log(phi_pt)
    pusai = (ALPHA_NEG * (1.0 - pt) + BETA_NEG) * k
    one_sided_w = jnp.power(1.0 - pt, pusai)
    loss_at_target = log_phi * one_sided_w
    loss = one_hot * loss_at_target + log_preds * (1.0 - one_hot)
    tc = one_hot * (1.0 - LS) + LS / C
    return -jnp.mean(jnp.sum(loss * tc, axis=-1))


if __name__ == "__main__":
    key = jax.random.PRNGKey(0)
    k_x, k_t, k_k = jax.random.split(key, 3)

    # Primary small shape (single tile, f32).
    B, C = 8, 32
    logits = jax.random.normal(k_x, (B, C), dtype=jnp.float32)
    target = jax.random.randint(k_t, (B,), 0, C, dtype=jnp.int32)
    k_ci = jax.random.randint(k_k, (C,), 0, 2, dtype=jnp.int32)  # per-class 0/1 flag

    loss = jax.block_until_ready(sgpl_loss(logits, target, k_ci))
    ref = sgpl_ref(logits, target, k_ci)
    assert jnp.allclose(loss, ref, atol=1e-5, rtol=1e-5), (loss, ref)

    # Tiled path: grid > 1, B not a multiple of the tile (masking), bf16 logits.
    B2, C2 = 37, 256
    logits2 = jax.random.normal(k_x, (B2, C2), dtype=jnp.float32).astype(jnp.bfloat16)
    target2 = jax.random.randint(k_t, (B2,), 0, C2, dtype=jnp.int32)
    k_ci2 = jax.random.randint(k_k, (C2,), 0, 2, dtype=jnp.int32)

    loss2 = jax.block_until_ready(sgpl_loss(logits2, target2, k_ci2, block_b=16))
    ref2 = sgpl_ref(logits2, target2, k_ci2)
    assert jnp.allclose(loss2, ref2, atol=1e-4, rtol=1e-4), (loss2, ref2)

    # Autosized path at a moderately larger shape (exercises the byte-based sizer).
    B3, C3 = 1536, 128
    logits3 = jax.random.normal(k_x, (B3, C3), dtype=jnp.bfloat16)
    target3 = jax.random.randint(k_t, (B3,), 0, C3, dtype=jnp.int32)
    k_ci3 = jax.random.randint(k_k, (C3,), 0, 2, dtype=jnp.int32)

    loss3 = jax.block_until_ready(sgpl_loss(logits3, target3, k_ci3))
    ref3 = sgpl_ref(logits3, target3, k_ci3)
    assert jnp.allclose(loss3, ref3, atol=1e-3, rtol=1e-3), (loss3, ref3)

    print("KERNEL_OK")
</pallas_src>

<mosaic_0001>
module attributes {stable_mosaic.version = 11 : i64} {
  func.func @_sgpl_kernel(%arg0: i32, %arg1: memref<8x32xf32, #tpu.memory_space<vmem>>, %arg2: memref<8x1xi32, #tpu.memory_space<vmem>>, %arg3: memref<8x1xf32, #tpu.memory_space<vmem>>, %arg4: memref<1x8x128xf32, #tpu.memory_space<vmem>>) attributes {dimension_semantics = [#tpu.dimension_semantics<parallel>], iteration_bounds = array<i64: 1>, scalar_prefetch = 0 : i64, scratch_operands = 0 : i64, tpu.core_type = #tpu.core_type<tc>, window_params = [{transform_indices = @transform_0, window_bounds = array<i64: 8, 32>}, {transform_indices = @transform_1, window_bounds = array<i64: 8, 1>}, {transform_indices = @transform_2, window_bounds = array<i64: 8, 1>}, {transform_indices = @transform_3, window_bounds = array<i64: 1, 8, 128>}]} {
    %c0 = arith.constant 0 : index
    %c0_0 = arith.constant 0 : index
    %0 = vector.load %arg1[%c0, %c0_0] : memref<8x32xf32, #tpu.memory_space<vmem>>, vector<8x32xf32>
    %c0_1 = arith.constant 0 : index
    %c0_2 = arith.constant 0 : index
    %1 = vector.load %arg2[%c0_1, %c0_2] : memref<8x1xi32, #tpu.memory_space<vmem>>, vector<8x1xi32>
    %c0_3 = arith.constant 0 : index
    %c0_4 = arith.constant 0 : index
    %2 = vector.load %arg3[%c0_3, %c0_4] : memref<8x1xf32, #tpu.memory_space<vmem>>, vector<8x1xf32>
    %cst = arith.constant dense<0xFF800000> : vector<8xf32>
    %3 = vector.multi_reduction <maximumf>, %0, %cst [1] : vector<8x32xf32> to vector<8xf32>
    %4 = vector.shape_cast %3 : vector<8xf32> to vector<8x1xf32>
    %5 = vector.broadcast %4 : vector<8x1xf32> to vector<8x32xf32>
    %6 = arith.subf %0, %5 : vector<8x32xf32>
    %7 = math.exp %6 : vector<8x32xf32>
    %cst_5 = arith.constant dense<0.000000e+00> : vector<8xf32>
    %8 = vector.multi_reduction <add>, %7, %cst_5 [1] : vector<8x32xf32> to vector<8xf32>
    %9 = vector.shape_cast %8 : vector<8xf32> to vector<8x1xf32>
    %10 = math.log %9 : vector<8x1xf32>
    %11 = tpu.iota {dimensions = array<i32: 1>} : vector<8x32xi32>
    %12 = vector.broadcast %1 : vector<8x1xi32> to vector<8x32xi32>
    %13 = arith.cmpi eq, %11, %12 : vector<8x32xi32>
    %cst_6 = arith.constant 0.000000e+00 : f32
    %14 = vector.broadcast %cst_6 : f32 to vector<8x32xf32>
    %15 = arith.select %13, %0, %14 : vector<8x32xi1>, vector<8x32xf32>
    %cst_7 = arith.constant dense<0.000000e+00> : vector<8xf32>
    %16 = vector.multi_reduction <add>, %15, %cst_7 [1] : vector<8x32xf32> to vector<8xf32>
    %17 = vector.shape_cast %16 : vector<8xf32> to vector<8x1xf32>
    %18 = arith.subf %17, %4 : vector<8x1xf32>
    %19 = arith.subf %18, %10 : vector<8x1xf32>
    %cst_8 = arith.constant dense<0.000000e+00> : vector<8xf32>
    %20 = vector.multi_reduction <add>, %6, %cst_8 [1] : vector<8x32xf32> to vector<8xf32>
    %21 = vector.shape_cast %20 : vector<8xf32> to vector<8x1xf32>
    %cst_9 = arith.constant 3.200000e+01 : f32
    %22 = vector.broadcast %cst_9 : f32 to vector<8x1xf32>
    %23 = arith.mulf %22, %10 : vector<8x1xf32>
    %24 = arith.subf %21, %23 : vector<8x1xf32>
    %25 = math.exp %19 : vector<8x1xf32>
    %cst_10 = arith.constant 5.000000e-02 : f32
    %26 = vector.broadcast %cst_10 : f32 to vector<8x1xf32>
    %27 = arith.mulf %2, %26 : vector<8x1xf32>
    %28 = arith.addf %25, %27 : vector<8x1xf32>
    %cst_11 = arith.constant 1.000000e+00 : f32
    %29 = vector.broadcast %cst_11 : f32 to vector<8x1xf32>
    %30 = arith.minimumf %28, %29 : vector<8x1xf32>
    %31 = math.log %30 : vector<8x1xf32>
    %cst_12 = arith.constant 1.000000e+00 : f32
    %32 = vector.broadcast %cst_12 : f32 to vector<8x1xf32>
    %33 = arith.subf %32, %25 : vector<8x1xf32>
    %cst_13 = arith.constant -2.000000e+00 : f32
    %34 = vector.broadcast %cst_13 : f32 to vector<8x1xf32>
    %35 = arith.mulf %34, %33 : vector<8x1xf32>
    %cst_14 = arith.constant 6.000000e+00 : f32
    %36 = vector.broadcast %cst_14 : f32 to vector<8x1xf32>
    %37 = arith.addf %35, %36 : vector<8x1xf32>
    %38 = arith.mulf %37, %2 : vector<8x1xf32>
    %cst_15 = arith.constant 1.000000e+00 : f32
    %39 = vector.broadcast %cst_15 : f32 to vector<8x1xf32>
    %40 = arith.subf %39, %25 : vector<8x1xf32>
    %cst_16 = arith.constant 9.99999935E-39 : f32
    %41 = vector.broadcast %cst_16 : f32 to vector<8x1xf32>
    %42 = arith.maximumf %40, %41 : vector<8x1xf32>
    %cst_17 = arith.constant 0.000000e+00 : f32
    %43 = vector.broadcast %cst_17 : f32 to vector<8x1xf32>
    %44 = arith.cmpf oeq, %38, %43 : vector<8x1xf32>
    %45 = math.log %42 : vector<8x1xf32>
    %46 = arith.mulf %38, %45 : vector<8x1xf32>
    %47 = math.exp %46 : vector<8x1xf32>
    %cst_18 = arith.constant 1.000000e+00 : f32
    %48 = vector.broadcast %cst_18 : f32 to vector<8x1xf32>
    %49 = arith.select %44, %48, %47 : vector<8x1xi1>, vector<8x1xf32>
    %50 = arith.mulf %31, %49 : vector<8x1xf32>
    %cst_19 = arith.constant 0.903124988 : f32
    %51 = vector.broadcast %cst_19 : f32 to vector<8x1xf32>
    %52 = arith.mulf %50, %51 : vector<8x1xf32>
    %53 = arith.subf %24, %19 : vector<8x1xf32>
    %cst_20 = arith.constant 3.125000e-03 : f32
    %54 = vector.broadcast %cst_20 : f32 to vector<8x1xf32>
    %55 = arith.mulf %54, %53 : vector<8x1xf32>
    %56 = arith.addf %52, %55 : vector<8x1xf32>
    %57 = vector.shape_cast %56 : vector<8x1xf32> to vector<1x8x1xf32>
    %cst_21 = arith.constant dense<0.000000e+00> : vector<1xf32>
    %58 = vector.multi_reduction <add>, %57, %cst_21 [1, 2] : vector<1x8x1xf32> to vector<1xf32>
    %59 = vector.shape_cast %58 : vector<1xf32> to vector<1x1x1xf32>
    %60 = vector.extract %59[0, 0, 0] : f32 from vector<1x1x1xf32>
    %61 = vector.broadcast %60 : f32 to vector<1x8x128xf32>
    %c0_22 = arith.constant 0 : index
    %c0_23 = arith.constant 0 : index
    %c0_24 = arith.constant 0 : index
    %62 = vector.load %arg4[%c0_22, %c0_23, %c0_24] : memref<1x8x128xf32, #tpu.memory_space<vmem>>, vector<1x8x128xf32>
    tpu.vector_store %arg4[%c0_22, %c0_23, %c0_24], %61 {strides = array<i32>} : memref<1x8x128xf32, #tpu.memory_space<vmem>>, vector<1x8x128xf32>,
    return
  }
  func.func @transform_0(%arg0: i32) -> (i32, i32) {
    %c0_i32 = arith.constant 0 : i32
    %c0_i32_0 = arith.constant 0 : i32
    return %arg0, %c0_i32 : i32, i32
  }
  func.func @transform_1(%arg0: i32) -> (i32, i32) {
    %c0_i32 = arith.constant 0 : i32
    %c0_i32_0 = arith.constant 0 : i32
    return %arg0, %c0_i32 : i32, i32
  }
  func.func @transform_2(%arg0: i32) -> (i32, i32) {
    %c0_i32 = arith.constant 0 : i32
    %c0_i32_0 = arith.constant 0 : i32
    return %arg0, %c0_i32 : i32, i32
  }
  func.func @transform_3(%arg0: i32) -> (i32, i32, i32) {
    %c0_i32 = arith.constant 0 : i32
    %c0_i32_0 = arith.constant 0 : i32
    %c0_i32_1 = arith.constant 0 : i32
    return %arg0, %c0_i32, %c0_i32_0 : i32, i32, i32
  }
}

</mosaic_0001>

<bundles_post_ra>
// kernel: tpu_custom_call.1
= control target key start
LH: loop header
LB: loop body
LE: loop exit
PB: predicated region body
PF: predicated region fallthrough
CT: control target
= control target key end

     0   :  { %vm18_vm0 = vcmask 261120   ;;  %s186_s0 = inlined_call_operand.vmem [shape: f32[8,32], index: 0, kind: input, shape index: {}]   ;;  %s187_s1 = inlined_call_operand.vmem [shape: s32[8,1], index: 1, kind: input, shape index: {}]   ;;  %s188_s2 = inlined_call_operand.vmem [shape: f32[8,1], index: 2, kind: input, shape index: {}]   ;;  %s189_s3 = inlined_call_operand.hbm [shape: f32[1,8,128], index: 3, kind: output, shape index: {}]  }
   0x1   :  { %v15_v0 = vld [vmem:[%s186_s0] sm:$0xff] }
   0x2   :  { %8 = vsyncpa [#allocation3], 0  ;;  %v19_v1 = vsel %vm18_vm0, %v15_v0, -inf  ;;  %v139_v2 = vmov 0   ;;  %v16_v3 = vld [vmem:[%s187_s1] sm:$0xff]  ;;  %v30_v7 = vlaneseq  ;;  %vm71_vm3 = vcmask 7168  }
   0x3   :  { %102 = vset.pattern.permute.xlu0 %v139_v2  ;;  %v17_v25 = vld [vmem:[%s188_s2] sm:$0xff]  ;;  %s140_s2 = smov [#allocation2]  }
   0x4   :  { %20 = vmax.xlane.f32.xlu0 %v19_v1  ;;  %v31_v8 = vand.u32 127, %v30_v7  ;;  %v49_v26 = vmul.f32 0.05, %v17_v25  ;;  %s90_s16 = sshll.u32 %s140_s2, 4  ;;  %s91_s16 = int_to_ptr.vmem [resolvable:$true] %s90_s16 }
   0x5   :  { %s115_s18 = scalar_lea.vmem %s91_s16, 128  ;;  %p120_p1 = scmp.lt.s32.totalorder %s91_s16, %s91_s16 }
   0x6   :  { %p116_p0 = scmp.ne.s32.totalorder %s91_s16, %s115_s18  ;;  %p121_p2 = scmp.lt.s32.totalorder %s115_s18, %s115_s18 }
   0x8   :  { %p122_p3 = por %p121_p2, %p120_p1 }
   0xa   :  { %p123_p4 = pnand %p122_p3, %p116_p0 }
  0x1a   :  { %33 = vperm.xlu0 %102, %v16_v3  }
  0x91   :  { %v21_v4 = vpop.xlane.xlu0 %20 }
  0x92   :  { %v22_v5 = vsub.f32 %v15_v0, %v21_v4 }
  0x94   :  { %v23_v6 = vmul.f32 1.442695, %v22_v5  ;;  %v42_v14 = vsel %vm18_vm0, %v22_v5, 0.0 }
  0x96   :  { %103 = vpow2.f32 %v23_v6 }
  0x99   :  { %v34_v9 = vpop.permute.xlu0 %33 }
  0x9a   :  { %vm35_vm1 = vcmp.eq.s32.totalorder %v31_v8, %v34_v9 }
  0x9b   :  { %v36_v11 = vsel %vm35_vm1, %v15_v0, 0.0 }
  0x9c   :  { %v37_v13 = vsel %vm18_vm0, %v36_v11, 0.0 }
  0xa0   :  { %v104_v10 = vpop.eup %103 }
  0xa1   :  { %v25_v12 = vsel %vm18_vm0, %v104_v10, 0.0 }
  0xa2   :  { %26 = vadd.xlane.f32.xlu1 %v25_v12 }
  0xa6   :  { %38 = vadd.xlane.f32.xlu1 %v37_v13 }
  0xaa   :  { %43 = vadd.xlane.f32.xlu1 %v42_v14 }
 0x12f   :  { %v27_v15 = vpop.xlane.xlu1 %26 }
 0x130   :  { %105 = vlog2.f32 %v27_v15 }
 0x133   :  { %v39_v16 = vpop.xlane.xlu1 %38 }
 0x134   :  { %v40_v19 = vsub.f32 %v39_v16, %v21_v4 }
 0x137   :  { %v44_v37 = vpop.xlane.xlu1 %43 }
 0x13a   :  { %v106_v17 = vpop.eup %105 }
 0x13b   :  { %v29_v18 = vmul.f32 0.6931472, %v106_v17 }
 0x13d   :  { %v41_v20 = vsub.f32 %v40_v19, %v29_v18  ;;  %v45_v36 = vmul.f32 32.0, %v29_v18 }
 0x13f   :  { %v47_v21 = vmul.f32 1.442695, %v41_v20  ;;  %v46_v38 = vsub.f32 %v44_v37, %v45_v36 }
 0x141   :  { %107 = vpow2.f32 %v47_v21  ;;  %v68_v41 = vsub.f32 %v46_v38, %v41_v20 }
 0x143   :  { %v69_v45 = vmul.f32 0.003125, %v68_v41 }
 0x14b   :  { %v108_v22 = vpop.eup %107 }
 0x14c   :  { %v54_v23 = vsub.f32 1.0, %v108_v22  ;;  %v50_v28 = vadd.f32 %v108_v22, %v49_v26 }
 0x14e   :  { %v58_v24 = vmax.f32 %v54_v23, 1e-38  ;;  %v55_v27 = vmul.f32 -2.0, %v54_v23  ;;  %v51_v31 = vmin.f32 %v50_v28, 1.0 }
 0x150   :  { %109 = vlog2.f32 %v58_v24  ;;  %v56_v29 = vadd.f32 6.0, %v55_v27 }
 0x151   :  { %111 = vlog2.f32 %v51_v31 }
 0x152   :  { %v57_v32 = vmul.f32 %v56_v29, %v17_v25 }
 0x154   :  { %vm59_vm2 = vcmp.eq.f32.partialorder %v57_v32, 0.0 }
 0x15a   :  { %v110_v30 = vpop.eup %109 }
 0x15b   :  { %v61_v33 = vmul.f32 0.6931472, %v110_v30  ;;  %v112_v39 = vpop.eup %111 }
 0x15c   :  { %v53_v42 = vmul.f32 0.6931472, %v112_v39 }
 0x15d   :  { %v62_v34 = vmul.f32 %v61_v33, %v57_v32 }
 0x15f   :  { %v63_v35 = vmul.f32 1.442695, %v62_v34 }
 0x161   :  { %113 = vpow2.f32 %v63_v35 }
 0x16b   :  { %v114_v40 = vpop.eup %113 }
 0x16c   :  { %v65_v43 = vsel %vm59_vm2, 1.0, %v114_v40 }
 0x16d   :  { %v66_v44 = vmul.f32 %v65_v43, %v53_v42 }
 0x16f   :  { %v67_v46 = vmul.f32 0.903125, %v66_v44 }
 0x171   :  { %v70_v47 = vadd.f32 %v69_v45, %v67_v46 }
 0x173   :  { %v72_v48 = vsel %vm71_vm3, %v70_v47, 0.0 }
 0x174   :  { %73 = vadd.xlane.f32.xlu1 %v72_v48 }
 0x201   :  { %v74_v49 = vpop.xlane.xlu1 %73 }
 0x202   :  { %v75_v50 = vrot.slane %v74_v49, 4 }
 0x204   :  { %v76_v51 = vadd.f32 %v75_v50, %v74_v49 }
 0x206   :  { %v77_v52 = vrot.slane %v76_v51, 2 }
 0x208   :  { %v78_v53 = vadd.f32 %v77_v52, %v76_v51 }
 0x20a   :  { %v79_v54 = vrot.slane %v78_v53, 1 }
 0x20c   :  { %v80_v55 = vadd.f32 %v79_v54, %v78_v53 }
 0x20e   :  { %98 = vpush %v80_v55 }
 0x23f   :  { %s99_s17 = spop %98 }
 0x240   :  { %v82_v56 = vstv %s99_s17 }
 0x241   :  { %83 = vst [vmem:[#allocation2] sm:$0xff] %v82_v56 }
 0x242   :  { %126 = shalt.err (!%p123_p4)
}
 0x243   :  { %s127_s21 = scalar_lea.hbm %s189_s3, 128 }
 0x244   :  { %p128_p5 = scmp.ne.s32.totalorder %s189_s3, %s127_s21  ;;  %p131_p6 = scmp.lt.u32.totalorder %s127_s21, %s189_s3 }
 0x246   :  { %p133_p7 = pnand %p131_p6, %p128_p5 }
 0x248   :  { %136 = shalt.err (!%p133_p7)
}
 0x249   :  { %93 = dma.vmem_to_hbm [thread:$0]  %s91_s16, 128, %s189_s3, [#allocation3]  }
 0x24a   :  { %137 = dma.done.wait [#allocation3], 128  }
 0x24b   :  { %138 = vsyncadd [#allocation3], 4294967168 }
 0x24c   :  { %97 = vsyncpa [#allocation3], 1 }

</bundles_post_ra>
